<compile_context>
chip_gen: v5e
topology: v5e:2x2
jax: 0.10.0
libtpu: 0.0.40
codegen_flags: <defaults>
</compile_context>

<pallas_src>
import functools

import jax
import jax.numpy as jnp
from jax.experimental import pallas as pl
from jax.experimental.pallas import tpu as pltpu

_BATCH_TILE = 1024          # batch tile once the batch axis is worth tiling
_BF16_MIN_WIDTH = 256       # cast matmul inputs to bf16 once layers are this wide


def _fused_mlp_kernel(*refs, n_layers: int, use_bf16: bool):
    """refs = (x_ref, w1_ref, b1_ref, ..., wn_ref, bn_ref, o_ref).

    All layers run back-to-back; the running activation `h` never leaves
    vregs/VMEM.  Biases are (1, d_out) and broadcast in the add.
    """
    x_ref = refs[0]
    o_ref = refs[1 + 2 * n_layers]
    h = x_ref[...]
    for i in range(n_layers):
        w = refs[1 + 2 * i][...]
        b = refs[2 + 2 * i][...]
        if use_bf16:
            # MXU-friendly narrow inputs, f32 accumulation, f32 epilogue.
            h = jnp.dot(h.astype(jnp.bfloat16), w.astype(jnp.bfloat16),
                        preferred_element_type=jnp.float32) + b
        else:
            h = jnp.dot(h, w, preferred_element_type=jnp.float32) + b
        if i != n_layers - 1:
            h = jnp.maximum(h, 0.0)
            # TODO(synk): training-mode dropout (p=0.1) would mask `h` here
            # using pltpu.prng_seed + pltpu.prng_random_bits.
    o_ref[...] = h.astype(o_ref.dtype)


def init_evidence_net_params(key, dims, num_classes):
    """Parameter init mirroring nn.Linear(dims[i], dims[i+1]) layer shapes.

    PyTorch nn.Linear weight is (out, in); we store the transposed (in, out)
    layout so each layer is y = x @ W + b.  Biases are stored (1, out) once
    here so the forward path does no per-call reshaping or padding.
    """
    layer_dims = list(dims) + [num_classes]
    params = []
    for i in range(len(layer_dims) - 1):
        d_in, d_out = layer_dims[i], layer_dims[i + 1]
        key, wk, bk = jax.random.split(key, 3)
        bound = 1.0 / jnp.sqrt(d_in)
        w = jax.random.uniform(wk, (d_in, d_out), jnp.float32, -bound, bound)
        b = jax.random.uniform(bk, (1, d_out), jnp.float32, -bound, bound)
        params.append((w, b))
    return params


def evidence_net_forward(x, params, num_classes):
    """Fused forward pass: one pallas_call for the whole MLP.

    Returns (batch, num_classes), matching the PyTorch module in eval() mode.
    No input/weight/output padding and no trailing slice.
    """
    batch, d_in = x.shape
    n_layers = len(params)
    assert params[0][0].shape[0] == d_in
    assert params[-1][0].shape[1] == num_classes

    flat_params = []
    for w, b in params:
        flat_params.extend([w, b])

    use_bf16 = max(max(w.shape) for w, _ in params) >= _BF16_MIN_WIDTH
    kernel = functools.partial(_fused_mlp_kernel,
                               n_layers=n_layers, use_bf16=use_bf16)
    out_shape = jax.ShapeDtypeStruct((batch, num_classes), jnp.float32)

    if batch <= _BATCH_TILE:
        # Small batch: gridless single launch, full-array VMEM blocks (exempt
        # from (8,128) divisibility), everything at its real size.
        return pl.pallas_call(
            kernel,
            out_shape=out_shape,
            in_specs=[pl.BlockSpec(memory_space=pltpu.MemorySpace.VMEM)]
            * (1 + 2 * n_layers),
            out_specs=pl.BlockSpec(memory_space=pltpu.MemorySpace.VMEM),
        )(x, *flat_params)

    # Large batch: tile rows at their real feature width; weights/biases are
    # grid-invariant full-shape blocks (trailing dims equal full array dims,
    # so no padding needed).  The ragged last row-block is masked by Pallas.
    in_specs = [pl.BlockSpec((_BATCH_TILE, d_in), lambda i: (i, 0))]
    for w, b in params:
        # Constant index_map => block never changes across the grid.  A
        # pipeline_mode=pl.Buffered(1) here would halve weight-resident VMEM;
        # irrelevant at these sizes, revisit when hidden dims grow (v7x first).
        in_specs.append(pl.BlockSpec(w.shape, lambda i: (0, 0)))
        in_specs.append(pl.BlockSpec(b.shape, lambda i: (0, 0)))
    return pl.pallas_call(
        kernel,
        out_shape=out_shape,
        grid=(pl.cdiv(batch, _BATCH_TILE),),
        in_specs=in_specs,
        out_specs=pl.BlockSpec((_BATCH_TILE, num_classes), lambda i: (i, 0)),
        compiler_params=pltpu.CompilerParams(
            # "parallel" lets Mosaic shard the row-tile axis across v7x's two
            # TensorCores; switch to pltpu.CORE_PARALLEL if the dump shows no
            # core-level split.
            dimension_semantics=("parallel",),
            vmem_limit_bytes=32 * 1024 * 1024,
        ),
    )(x, *flat_params)


if __name__ == "__main__":
    # Small shapes consistent with the module: dims=[32, 64, 32], num_classes=4.
    dims = [32, 64, 32]
    num_classes = 4

    key = jax.random.PRNGKey(0)
    key, xk1, xk2 = jax.random.split(key, 3)
    params = init_evidence_net_params(key, dims, num_classes)

    def ref_forward(x):
        h = x
        for i, (w, b) in enumerate(params):
            h = h @ w + b
            if i != len(params) - 1:
                h = jnp.maximum(h, 0.0)
        return h

    # Gridless path: batch=8.
    x_small = jax.random.normal(xk1, (8, dims[0]), jnp.float32)
    out_small = jax.block_until_ready(
        evidence_net_forward(x_small, params, num_classes))
    assert out_small.shape == (8, num_classes)
    assert jnp.allclose(out_small, ref_forward(x_small), atol=1e-5), \
        "gridless path mismatch vs. JAX reference"

    # Batch-tiled path with a ragged last block: batch=1537 -> grid of 2 tiles,
    # second tile has 513 valid rows (exercises Pallas write masking).
    x_big = jax.random.normal(xk2, (1537, dims[0]), jnp.float32)
    out_big = jax.block_until_ready(
        evidence_net_forward(x_big, params, num_classes))
    assert out_big.shape == (1537, num_classes)
    assert jnp.allclose(out_big, ref_forward(x_big), atol=1e-5), \
        "grid path mismatch vs. JAX reference"

    print("KERNEL_OK")
</pallas_src>

<mosaic_0001>
module attributes {stable_mosaic.version = 11 : i64} {
  func.func @_fused_mlp_kernel(%arg0: memref<8x32xf32, #tpu.memory_space<vmem>>, %arg1: memref<32x64xf32, #tpu.memory_space<vmem>>, %arg2: memref<1x64xf32, #tpu.memory_space<vmem>>, %arg3: memref<64x32xf32, #tpu.memory_space<vmem>>, %arg4: memref<1x32xf32, #tpu.memory_space<vmem>>, %arg5: memref<32x4xf32, #tpu.memory_space<vmem>>, %arg6: memref<1x4xf32, #tpu.memory_space<vmem>>, %arg7: memref<8x4xf32, #tpu.memory_space<vmem>>) attributes {dimension_semantics = [], scalar_prefetch = 0 : i64, scratch_operands = 0 : i64, tpu.core_type = #tpu.core_type<tc>} {
    %c0 = arith.constant 0 : index
    %c0_0 = arith.constant 0 : index
    %0 = vector.load %arg0[%c0, %c0_0] : memref<8x32xf32, #tpu.memory_space<vmem>>, vector<8x32xf32>
    %c0_1 = arith.constant 0 : index
    %c0_2 = arith.constant 0 : index
    %1 = vector.load %arg1[%c0_1, %c0_2] : memref<32x64xf32, #tpu.memory_space<vmem>>, vector<32x64xf32>
    %c0_3 = arith.constant 0 : index
    %c0_4 = arith.constant 0 : index
    %2 = vector.load %arg2[%c0_3, %c0_4] : memref<1x64xf32, #tpu.memory_space<vmem>>, vector<1x64xf32>
    %cst = arith.constant dense<0.000000e+00> : vector<8x64xf32>
    %3 = tpu.matmul %0, %1, %cst {dimension_numbers = #tpu.dot_dimension_numbers<[1], [0], [0], [1], [0, 0, 1, 1], [], []>} : vector<8x32xf32>, vector<32x64xf32>, vector<8x64xf32> -> vector<8x64xf32>
    %4 = vector.broadcast %2 : vector<1x64xf32> to vector<8x64xf32>
    %5 = arith.addf %3, %4 : vector<8x64xf32>
    %cst_5 = arith.constant 0.000000e+00 : f32
    %6 = vector.broadcast %cst_5 : f32 to vector<8x64xf32>
    %7 = arith.maximumf %5, %6 : vector<8x64xf32>
    %c0_6 = arith.constant 0 : index
    %c0_7 = arith.constant 0 : index
    %8 = vector.load %arg3[%c0_6, %c0_7] : memref<64x32xf32, #tpu.memory_space<vmem>>, vector<64x32xf32>
    %c0_8 = arith.constant 0 : index
    %c0_9 = arith.constant 0 : index
    %9 = vector.load %arg4[%c0_8, %c0_9] : memref<1x32xf32, #tpu.memory_space<vmem>>, vector<1x32xf32>
    %cst_10 = arith.constant dense<0.000000e+00> : vector<8x32xf32>
    %10 = tpu.matmul %7, %8, %cst_10 {dimension_numbers = #tpu.dot_dimension_numbers<[1], [0], [0], [1], [0, 0, 1, 1], [], []>} : vector<8x64xf32>, vector<64x32xf32>, vector<8x32xf32> -> vector<8x32xf32>
    %11 = vector.broadcast %9 : vector<1x32xf32> to vector<8x32xf32>
    %12 = arith.addf %10, %11 : vector<8x32xf32>
    %cst_11 = arith.constant 0.000000e+00 : f32
    %13 = vector.broadcast %cst_11 : f32 to vector<8x32xf32>
    %14 = arith.maximumf %12, %13 : vector<8x32xf32>
    %c0_12 = arith.constant 0 : index
    %c0_13 = arith.constant 0 : index
    %15 = vector.load %arg5[%c0_12, %c0_13] : memref<32x4xf32, #tpu.memory_space<vmem>>, vector<32x4xf32>
    %c0_14 = arith.constant 0 : index
    %c0_15 = arith.constant 0 : index
    %16 = vector.load %arg6[%c0_14, %c0_15] : memref<1x4xf32, #tpu.memory_space<vmem>>, vector<1x4xf32>
    %cst_16 = arith.constant dense<0.000000e+00> : vector<8x4xf32>
    %17 = tpu.matmul %14, %15, %cst_16 {dimension_numbers = #tpu.dot_dimension_numbers<[1], [0], [0], [1], [0, 0, 1, 1], [], []>} : vector<8x32xf32>, vector<32x4xf32>, vector<8x4xf32> -> vector<8x4xf32>
    %18 = vector.broadcast %16 : vector<1x4xf32> to vector<8x4xf32>
    %19 = arith.addf %17, %18 : vector<8x4xf32>
    %c0_17 = arith.constant 0 : index
    %c0_18 = arith.constant 0 : index
    %20 = vector.load %arg7[%c0_17, %c0_18] : memref<8x4xf32, #tpu.memory_space<vmem>>, vector<8x4xf32>
    tpu.vector_store %arg7[%c0_17, %c0_18], %19 {strides = array<i32>} : memref<8x4xf32, #tpu.memory_space<vmem>>, vector<8x4xf32>,
    return
  }
}

</mosaic_0001>

<bundles_post_ra>
// kernel: tpu_custom_call.1
= control target key start
LH: loop header
LB: loop body
LE: loop exit
PB: predicated region body
PF: predicated region fallthrough
CT: control target
= control target key end

     0   :  { %vm35_vm0 = vcmask 261120   ;;  %vm72_vm1 = vcmask 523264   ;;  %vm128_vm2 = vcmask 31744   ;;  %s245_s1 = inlined_call_operand.vmem [shape: f32[32,64], index: 1, kind: input, shape index: {}]   ;;  %s246_s3 = inlined_call_operand.vmem [shape: f32[64,32], index: 3, kind: input, shape index: {}]   ;;  %s247_s0 = inlined_call_operand.vmem [shape: f32[8,32], index: 0, kind: input, shape index: {}]   ;;  %s248_s2 = inlined_call_operand.vmem [shape: f32[1,64], index: 2, kind: input, shape index: {}]   ;;  %s249_s4 = inlined_call_operand.vmem [shape: f32[1,32], index: 4, kind: input, shape index: {}]   ;;  %s250_s5 = inlined_call_operand.vmem [shape: f32[32,4], index: 5, kind: input, shape index: {}]   ;;  %s251_s6 = inlined_call_operand.vmem [shape: f32[1,4], index: 6, kind: input, shape index: {}]   ;;  %s252_s7 = inlined_call_operand.vmem [shape: f32[8,4], index: 7, kind: output, shape index: {}]  }
   0x1   :  { %v30_v0 = vld [vmem:[%s245_s1 + $0x18] sm:$0xff]  ;;  %v29_v1 = vld [vmem:[%s245_s1 + $0x10] sm:$0xff]  ;;  %v28_v3 = vld [vmem:[%s245_s1 + $0x8] sm:$0xff] }
   0x2   :  { %51 = vmatpush.msra.mxu0 %v30_v0  ;;  %v67_v2 = vld [vmem:[%s246_s3 + $0x38] sm:$0xff]  ;;  %v66_v4 = vld [vmem:[%s246_s3 + $0x30] sm:$0xff]  ;;  %v65_v5 = vld [vmem:[%s246_s3 + $0x28] sm:$0xff] }
   0x3   :  { %84 = vmatpush.msra.mxu1 %v67_v2  ;;  %v27_v6 = vld [vmem:[%s245_s1] sm:$0xff]  ;;  %v63_v9 = vld [vmem:[%s246_s3 + $0x18] sm:$0xff]  ;;  %v62_v10 = vld [vmem:[%s246_s3 + $0x10] sm:$0xff] }
   0x4   :  { %52 = vmatpush.msra.mxu0 %v29_v1  ;;  %v26_v7 = vld [vmem:[%s247_s0] sm:$0xff]  ;;  %v61_v11 = vld [vmem:[%s246_s3 + $0x8] sm:$0xff]  ;;  %v100_v13 = vld [vmem:[%s250_s5 + $0x18] sm:$0xff] }
   0x5   :  { %85 = vmatpush.msra.mxu1 %v66_v4  ;;  %v64_v8 = vld [vmem:[%s246_s3 + $0x20] sm:$0xff]  ;;  %120 = vmatpush.msra.mxu2 %v100_v13  ;;  %v99_v18 = vld [vmem:[%s250_s5 + $0x10] sm:$0xff]  ;;  %v98_v19 = vld [vmem:[%s250_s5 + $0x8] sm:$0xff] }
   0x6   :  { %53 = vmatpush.msra.mxu0 %v28_v3  ;;  %v60_v12 = vld [vmem:[%s246_s3] sm:$0xff] }
   0x7   :  { %86 = vmatpush.msra.mxu1 %v65_v5  ;;  %v137_v14 = vld [vmem:[%s248_s2] ss:$0 sm:$0xff]  ;;  %121 = vmatpush.msra.mxu2 %v99_v18 }
   0x8   :  { %54 = vmatpush.msra.mxu0 %v27_v6  ;;  %v97_v20 = vld [vmem:[%s250_s5] sm:$0xff] }
   0x9   :  { %134 = vmatmul.msk.f32.vlgmr.msra.gmra.mxu0 %vm35_vm0, %v26_v7  ;;  %87 = vmatpush.msra.mxu1 %v64_v8  ;;  %v138_v21 = vld [vmem:[%s249_s4] ss:$0 sm:$0xff] }
   0xa   :  { %122 = vmatpush.msra.mxu2 %v98_v19  ;;  %v139_v25 = vld [vmem:[%s251_s6] ss:$0 sm:$0xff] }
   0xb   :  { %88 = vmatpush.msra.mxu1 %v63_v9 }
   0xc   :  { %123 = vmatpush.msra.mxu2 %v97_v20 }
   0xd   :  { %89 = vmatpush.msra.mxu1 %v62_v10 }
   0xf   :  { %90 = vmatpush.msra.mxu1 %v61_v11 }
  0x11   :  { %91 = vmatpush.msra.mxu1 %v60_v12 }
  0x86   :  { %v56_v15 = vpop.f32.mrf.mxu0 }
  0x87   :  { %v57_v16 = vadd.f32 %v137_v14, %v56_v15 }
  0x89   :  { %v59_v17 = vmax.f32 %v57_v16, 0.0 }
  0x8b   :  { %135 = vmatmul.msk.f32.vlgmr.msra.gmra.mxu1 %vm72_vm1, %v59_v17 }
 0x108   :  { %v93_v22 = vpop.f32.mrf.mxu1 }
 0x109   :  { %v94_v23 = vadd.f32 %v138_v21, %v93_v22 }
 0x10b   :  { %v96_v24 = vmax.f32 %v94_v23, 0.0 }
 0x10d   :  { %136 = vmatmul.msk.f32.vlgmr.msra.gmra.mxu2 %vm35_vm0, %v96_v24 }
 0x190   :  { %v125_v26 = vpop.f32.mrf.mxu2 }
 0x191   :  { %v126_v27 = vadd.f32 %v139_v25, %v125_v26 }
 0x193   :  { %129 = vst.msk [vmem:[%s252_s7] sm:$0xff] %vm128_vm2, %v126_v27 }

</bundles_post_ra>
